<compile_context>
chip_gen: v7x
topology: tpu7x:2x2x1
jax: 0.10.0
libtpu: 0.0.40
codegen_flags: <defaults>
</compile_context>

<pallas_src>
import functools
import math

import jax
import jax.numpy as jnp
from jax import lax
from jax.experimental import pallas as pl
from jax.experimental.pallas import tpu as pltpu


def _attention_kernel(x_ref, wqkv_ref, o_ref, *, seq_len, dim_attn, dim_val,
                      batch_tile):
    """x_ref:   (rows, Dv)        bf16 rows for this batch tile (rows = batch_tile*S)
       wqkv_ref:(Dv, 2*Da + Dv)   bf16 fused projection weight [scale*Wq^T | Wk^T | Wv^T]
       o_ref:   (rows, Dv)        f32 output rows
    """
    rows = batch_tile * seq_len
    x = x_ref[...]                                           # bf16 (rows, Dv)

    # One fused projection matmul on the MXU (bf16 in, f32 accumulate).
    # The 1/sqrt(dim_attn) scale is pre-folded into the Wq^T columns.
    qkv = jnp.dot(x, wqkv_ref[...],
                  preferred_element_type=jnp.float32)        # f32 (rows, 2Da+Dv)

    q = qkv[:, 0:dim_attn].astype(jnp.bfloat16)              # (rows, Da)
    k = qkv[:, dim_attn:2 * dim_attn].astype(jnp.bfloat16)   # (rows, Da)
    v = qkv[:, 2 * dim_attn:2 * dim_attn + dim_val].astype(jnp.bfloat16)

    # Single scores matmul over the whole tile; contract last axes (no k.T).
    s = lax.dot_general(q, k, (((1,), (1,)), ((), ())),
                        preferred_element_type=jnp.float32)  # f32 (rows, rows)

    if batch_tile > 1:
        # Block-diagonal mask: only rows/cols from the same batch element attend.
        row_id = lax.broadcasted_iota(jnp.int32, (rows, rows), 0)
        col_id = lax.broadcasted_iota(jnp.int32, (rows, rows), 1)
        same_batch = (row_id // seq_len) == (col_id // seq_len)
        # Mask BEFORE row-max subtraction; every row contains its own diagonal
        # block, so the row max is finite and exp(-inf)=0 — no NaNs.
        s = jnp.where(same_batch, s, -jnp.inf)

    # Numerically-stable softmax in f32; denominator via EUP approx reciprocal.
    s = s - jnp.max(s, axis=-1, keepdims=True)
    p = jnp.exp(s)
    a = p * pl.reciprocal(jnp.sum(p, axis=-1, keepdims=True), approx=True)

    out = jnp.dot(a.astype(jnp.bfloat16), v,
                  preferred_element_type=jnp.float32)        # f32 (rows, Dv)
    o_ref[...] = out.astype(o_ref.dtype)


def attention_block(x, wq, wk, wv, *, batch_tile=None):
    """x: (B, S, dim_val); wq/wk: (dim_attn, dim_val); wv: (dim_val, dim_val),
    weights in PyTorch nn.Linear layout (out_features, in_features).
    Returns (B, S, dim_val) float32 == attention(Q(x), K(x), V(x))."""
    B, S, Dv = x.shape
    Da = wq.shape[0]

    if batch_tile is None:
        # >= 2 grid steps: enables BlockSpec double-buffering (DMA/compute
        # overlap) and lets v7x's 2 TensorCores both take work on the
        # "parallel" batch axis.  Cap rows/step so per-step VMEM (x, out
        # double-buffers + qkv/score temps) stays modest on v7x's 64 MiB VMEM.
        batch_tile = max(1, B // 2)
        max_rows_per_step = 512
        while batch_tile > 1 and batch_tile * S > max_rows_per_step:
            batch_tile //= 2
        while B % batch_tile != 0:
            batch_tile -= 1
    assert B % batch_tile == 0

    # Fused, pre-transposed projection weight (Dv, 2*Da + Dv):
    # [ (1/sqrt(Da)) * Wq^T | Wk^T | Wv^T ], cast once to bf16.
    scale = 1.0 / math.sqrt(Da)
    wqkv = jnp.concatenate(
        [jnp.asarray(wq, jnp.float32).T * scale,
         jnp.asarray(wk, jnp.float32).T,
         jnp.asarray(wv, jnp.float32).T], axis=1).astype(jnp.bfloat16)

    # Fold batch into the matmul M dimension; bf16 MXU operands.
    x2d = jnp.asarray(x, jnp.float32).reshape(B * S, Dv).astype(jnp.bfloat16)

    n_out = 2 * Da + Dv
    rows_per_step = batch_tile * S
    grid = (B // batch_tile,)

    cost = pl.CostEstimate(
        flops=2 * B * S * Dv * n_out                       # fused projection
        + 2 * B * S * (batch_tile * S) * (Da + Dv),        # scores + A@V
        transcendentals=B * S * batch_tile * S,            # exp over masked tile
        bytes_accessed=B * S * Dv * 2 + Dv * n_out * 2 + B * S * Dv * 4,
    )

    kernel = functools.partial(_attention_kernel, seq_len=S, dim_attn=Da,
                               dim_val=Dv, batch_tile=batch_tile)

    out2d = pl.pallas_call(
        kernel,
        out_shape=jax.ShapeDtypeStruct((B * S, Dv), jnp.float32),
        grid_spec=pltpu.PrefetchScalarGridSpec(
            num_scalar_prefetch=0,
            grid=grid,
            in_specs=[
                pl.BlockSpec((rows_per_step, Dv), lambda i: (i, 0)),  # x rows
                pl.BlockSpec((Dv, n_out), lambda i: (0, 0)),          # fused W
            ],
            out_specs=pl.BlockSpec((rows_per_step, Dv), lambda i: (i, 0)),
        ),
        compiler_params=pltpu.CompilerParams(
            dimension_semantics=("parallel",),   # batch-tile axis (v7x megacore)
        ),
        cost_estimate=cost,
    )(x2d, wqkv)

    return out2d.reshape(B, S, Dv)


def _reference(x, wq, wk, wv):
    """Pure-JAX reference mirroring the PyTorch forward (f32)."""
    q = x @ wq.T
    k = x @ wk.T
    v = x @ wv.T
    s = jnp.einsum("bqa,bka->bqk", q, k) / jnp.sqrt(jnp.float32(q.shape[-1]))
    a = jax.nn.softmax(s, axis=-1)
    return jnp.einsum("bqk,bkd->bqd", a, v)


if __name__ == "__main__":
    # Small shapes consistent with the module: dim_val=32, dim_attn=16
    B, S, dim_val, dim_attn = 2, 8, 32, 16

    key = jax.random.PRNGKey(0)
    kx, kq, kk, kv_key = jax.random.split(key, 4)

    x = jax.random.normal(kx, (B, S, dim_val), dtype=jnp.float32)

    # Deterministic parameter init (PyTorch nn.Linear layout: (out, in)),
    # kaiming-uniform-ish bound 1/sqrt(fan_in).
    bound = 1.0 / (dim_val ** 0.5)
    wq = jax.random.uniform(kq, (dim_attn, dim_val), jnp.float32, -bound, bound)
    wk = jax.random.uniform(kk, (dim_attn, dim_val), jnp.float32, -bound, bound)
    wv = jax.random.uniform(kv_key, (dim_val, dim_val), jnp.float32, -bound, bound)

    # References:
    #  - bf16-matched: reference on the same bf16-quantized x/W the kernel feeds
    #    the MXU (isolates kernel logic from intentional quantization).
    #  - f32: straight torch-equivalent reference (loose tolerance).
    to_bf16 = lambda a: a.astype(jnp.bfloat16).astype(jnp.float32)
    ref_q = _reference(to_bf16(x), to_bf16(wq), to_bf16(wk), to_bf16(wv))
    ref_f32 = _reference(x, wq, wk, wv)

    # Default path: batch_tile = B // 2 = 1 -> grid=(2,), no mask needed.
    out = attention_block(x, wq, wk, wv)
    out = jax.block_until_ready(out)
    assert out.shape == (B, S, dim_val)
    assert jnp.allclose(out, ref_q, atol=2e-2, rtol=2e-2), \
        "mismatch vs bf16-matched reference (default tiling)"
    assert jnp.allclose(out, ref_f32, atol=1e-1, rtol=1e-1), \
        "mismatch vs f32 reference (default tiling)"

    # Exercise the block-diagonal-masked path: whole batch in one tile.
    out_bt = attention_block(x, wq, wk, wv, batch_tile=B)
    out_bt = jax.block_until_ready(out_bt)
    assert jnp.allclose(out_bt, ref_q, atol=2e-2, rtol=2e-2), \
        "mismatch vs bf16-matched reference (block-diagonal masked tiling)"
    assert jnp.allclose(out_bt, ref_f32, atol=1e-1, rtol=1e-1), \
        "mismatch vs f32 reference (block-diagonal masked tiling)"

    print("KERNEL_OK")
</pallas_src>

<mosaic_0001>
module attributes {stable_mosaic.version = 11 : i64} {
  func.func @_attention_kernel(%arg0: i32, %arg1: memref<8x32xbf16, #tpu.memory_space<vmem>>, %arg2: memref<32x64xbf16, #tpu.memory_space<vmem>>, %arg3: memref<8x32xf32, #tpu.memory_space<vmem>>) attributes {dimension_semantics = [#tpu.dimension_semantics<parallel>], iteration_bounds = array<i64: 2>, scalar_prefetch = 0 : i64, scratch_operands = 0 : i64, tpu.core_type = #tpu.core_type<tc>, window_params = [{transform_indices = @transform_0, window_bounds = array<i64: 8, 32>}, {pipeline_mode = #tpu.pipeline_mode<synchronous>, transform_indices = @transform_1, window_bounds = array<i64: 32, 64>}, {transform_indices = @transform_2, window_bounds = array<i64: 8, 32>}]} {
    %c0 = arith.constant 0 : index
    %c0_0 = arith.constant 0 : index
    %0 = vector.load %arg1[%c0, %c0_0] : memref<8x32xbf16, #tpu.memory_space<vmem>>, vector<8x32xbf16>
    %c0_1 = arith.constant 0 : index
    %c0_2 = arith.constant 0 : index
    %1 = vector.load %arg2[%c0_1, %c0_2] : memref<32x64xbf16, #tpu.memory_space<vmem>>, vector<32x64xbf16>
    %cst = arith.constant dense<0.000000e+00> : vector<8x64xf32>
    %2 = tpu.matmul %0, %1, %cst {dimension_numbers = #tpu.dot_dimension_numbers<[1], [0], [0], [1], [0, 0, 1, 1], [], []>} : vector<8x32xbf16>, vector<32x64xbf16>, vector<8x64xf32> -> vector<8x64xf32>
    %3 = vector.extract_strided_slice %2 {offsets = [0, 0], sizes = [8, 16], strides = [1, 1]} : vector<8x64xf32> to vector<8x16xf32>
    %4 = arith.truncf %3 : vector<8x16xf32> to vector<8x16xbf16>
    %5 = vector.extract_strided_slice %2 {offsets = [0, 16], sizes = [8, 16], strides = [1, 1]} : vector<8x64xf32> to vector<8x16xf32>
    %6 = arith.truncf %5 : vector<8x16xf32> to vector<8x16xbf16>
    %7 = vector.extract_strided_slice %2 {offsets = [0, 32], sizes = [8, 32], strides = [1, 1]} : vector<8x64xf32> to vector<8x32xf32>
    %8 = arith.truncf %7 : vector<8x32xf32> to vector<8x32xbf16>
    %cst_3 = arith.constant dense<0.000000e+00> : vector<8x8xf32>
    %9 = tpu.matmul %4, %6, %cst_3 {dimension_numbers = #tpu.dot_dimension_numbers<[1], [1], [0], [0], [0, 0, 1, 0], [], []>} : vector<8x16xbf16>, vector<8x16xbf16>, vector<8x8xf32> -> vector<8x8xf32>
    %cst_4 = arith.constant dense<0xFF800000> : vector<8xf32>
    %10 = vector.multi_reduction <maximumf>, %9, %cst_4 [1] : vector<8x8xf32> to vector<8xf32>
    %11 = vector.shape_cast %10 : vector<8xf32> to vector<8x1xf32>
    %12 = vector.broadcast %11 : vector<8x1xf32> to vector<8x8xf32>
    %13 = arith.subf %9, %12 : vector<8x8xf32>
    %14 = math.exp %13 : vector<8x8xf32>
    %cst_5 = arith.constant dense<0.000000e+00> : vector<8xf32>
    %15 = vector.multi_reduction <add>, %14, %cst_5 [1] : vector<8x8xf32> to vector<8xf32>
    %16 = vector.shape_cast %15 : vector<8xf32> to vector<8x1xf32>
    %17 = tpu.reciprocal %16 {approx = true} : vector<8x1xf32> -> vector<8x1xf32>
    %18 = vector.broadcast %17 : vector<8x1xf32> to vector<8x8xf32>
    %19 = arith.mulf %14, %18 : vector<8x8xf32>
    %20 = arith.truncf %19 : vector<8x8xf32> to vector<8x8xbf16>
    %cst_6 = arith.constant dense<0.000000e+00> : vector<8x32xf32>
    %21 = tpu.matmul %20, %8, %cst_6 {dimension_numbers = #tpu.dot_dimension_numbers<[1], [0], [0], [1], [0, 0, 1, 1], [], []>} : vector<8x8xbf16>, vector<8x32xbf16>, vector<8x32xf32> -> vector<8x32xf32>
    %c0_7 = arith.constant 0 : index
    %c0_8 = arith.constant 0 : index
    %22 = vector.load %arg3[%c0_7, %c0_8] : memref<8x32xf32, #tpu.memory_space<vmem>>, vector<8x32xf32>
    tpu.vector_store %arg3[%c0_7, %c0_8], %21 {strides = array<i32>} : memref<8x32xf32, #tpu.memory_space<vmem>>, vector<8x32xf32>,
    return
  }
  func.func @transform_0(%arg0: i32) -> (i32, i32) {
    %c0_i32 = arith.constant 0 : i32
    %c0_i32_0 = arith.constant 0 : i32
    return %arg0, %c0_i32 : i32, i32
  }
  func.func @transform_1(%arg0: i32) -> (i32, i32) {
    %c0_i32 = arith.constant 0 : i32
    %c0_i32_0 = arith.constant 0 : i32
    %c0_i32_1 = arith.constant 0 : i32
    return %c0_i32, %c0_i32_0 : i32, i32
  }
  func.func @transform_2(%arg0: i32) -> (i32, i32) {
    %c0_i32 = arith.constant 0 : i32
    %c0_i32_0 = arith.constant 0 : i32
    return %arg0, %c0_i32 : i32, i32
  }
}

</mosaic_0001>

<bundles_post_ra>
// kernel: tpu_custom_call.1
= control target key start
LH: loop header
LB: loop body
LE: loop exit
PB: predicated region body
PF: predicated region fallthrough
CT: control target
= control target key end

     0   :  { %7 = vsyncpa [#allocation3], 0  ;;  %s915_s0 = inlined_call_operand.hbm [shape: bf16[16,32], index: 0, kind: input, shape index: {}]   ;;  %s916_s1 = inlined_call_operand.hbm [shape: bf16[32,64], index: 1, kind: input, shape index: {}]   ;;  %s917_s2 = inlined_call_operand.hbm [shape: f32[16,32], index: 2, kind: output, shape index: {}]  }
   0x1   :  { %9 = vsyncpa [#allocation3 + $0x1], 0 }
   0x2   :  { %10 = vsyncpa [#allocation6], 0 }
   0x3   :  { %11 = vsyncpa [#allocation4], 0 }
   0x4   :  { %13 = vsyncpa [#allocation4 + $0x1], 0  ;;  %s713_s9 = smov 0   ;;  %s715_s10 = smov 0  }
   0x5   :  { %s717_s11 = smov 0   ;;  %s719_s12 = smov 0  }
   0x6 LB: > { %s734_s13 = sadd.s32 4294967295, %s687_s12   ;;  %s444_s14 = sadd.s32 4294967294, %s687_s12   ;;  %s687_s12 = sphi %s719_s12, %s937_s12   ;;  %s683_s11 = sphi %s717_s11, %s936_s11   ;;  %s679_s10 = sphi %s715_s10, %s935_s10   ;;  %s675_s9 = sphi %s713_s9, %s934_s9  }
   0x7   : > { %p39_p0 = scmp.ne.s32.totalorder %s679_s10, %s675_s9  ;;  %p918_p1 = scmp.eq.s32.totalorder %s734_s13, 0 }
   0x8   : > { %p90_p3 = scmp.eq.s32.totalorder %s444_s14, 1  ;;  %p445_p5 = scmp.ge.s32.totalorder %s687_s12, 1 }
   0x9   : > { %p743_p4 = por %p918_p1, %p39_p0  ;;  %p97_p7 = scmp.lt.s32.totalorder %s687_s12, 3 }
   0xa   : > { %p748_p6 = por %p90_p3, %p39_p0  ;;  %s689_s18 = smov [#allocation5]  }
   0xb   : > { %s921_s15 = scalar_select %p743_p4, 1, 0 }
   0xc   : > { %s922_s16 = scalar_select %p748_p6, 1, 0 }
   0xd   : > { %p753_p8 = pnand %p445_p5, %p97_p7  ;;  %s109_s19 = sshll.u32 %s689_s18, 4  ;;  %s757_s19 = int_to_ptr.vmem [resolvable:$true] %s109_s19 }
   0xe   : > { %s769_s21 = sadd.s32 1, %s687_s12   ;;  %s26_s22 = sadd.s32 1, %s683_s11 }
   0xf   : > { %s923_s17 = scalar_select %p753_p8, 1, 0 }
  0x10   : > { %p498_p9 = pneg %p753_p8  ;;  %s23_s23 = ssub.s32 %s687_s12, %s769_s21 }
  0x11   : > { %s559_s26 = scalar_lea.hbm %s916_s1, 256 }
  0x12   : > { %p764_p11 = pnand %p498_p9, %p918_p1  ;;  %p560_p12 = scmp.ne.s32.totalorder %s916_s1, %s559_s26 }
  0x13   : > { %p566_p5 = scmp.lt.u32.totalorder %s559_s26, %s916_s1 }
  0x14   : > { %p561_p13 = pneg %p764_p11 }
  0x16   : > { %p562_p0 = pnand %p561_p13, %p560_p12 }
  0x18   : > { %p563_p3 = pneg %p562_p0 }
  0x1a   : > { %p568_p7 = pnand %p566_p5, %p563_p3 }
  0x1c   : > { %571 = shalt.err (!%p568_p7)
}
  0x1d   : > { %s572_s3 = scalar_lea.vmem %s757_s19, 256  ;;  %p580_p2 = scmp.lt.s32.totalorder %s757_s19, %s757_s19 }
  0x1e   : > { %p573_p9 = scmp.ne.s32.totalorder %s757_s19, %s572_s3  ;;  %p581_p6 = scmp.lt.s32.totalorder %s572_s3, %s572_s3 }
  0x20   : > { %p575_p10 = pnand %p573_p9, %p561_p13  ;;  %p582_p4 = por %p581_p6, %p580_p2 }
  0x22   : > { %p576_p1 = pneg %p575_p10 }
  0x24   : > { %p583_p8 = pnand %p582_p4, %p576_p1 }
  0x26   : > { %586 = shalt.err (!%p583_p8)
}
  0x27   : > { %s690_s4 = smov 64   ;;  %s691_s5 = smov 4  }
  0x28   : > { %501 = dma.hbm_to_vmem [thread:$0]  (!%p764_p11), %s916_s1, 256, %s757_s19, [#allocation6], %s690_s4, %s690_s4, %s691_s5  }
  0x29   : > { %p24_p2 = scmp.eq.s32.totalorder %s23_s23, 0  ;;  %p33_p1 = scmp.ne.s32.totalorder %s683_s11, %s679_s10 }
  0x2a   : > { %p34_p4 = scmp.eq.s32.totalorder %s687_s12, 0  ;;  %p511_p6 = scmp.lt.s32.totalorder %s687_s12, 2 }
  0x2b   : > { %s800_s8 = scalar_select %p24_p2, %s683_s11, %s26_s22  }
  0x2c   : > { %p35_p8 = por %p34_p4, %p33_p1  ;;  %p925_p10 = scmp.eq.s32.totalorder %s734_s13, 1 }
  0x2d   : > { %s123_s18 = sand.u32 1, %s683_s11   ;;  %s449_s24 = sshll.u32 %s687_s12, 6 }
  0x2e   : > { %p804_p12 = por %p925_p10, %p33_p1  ;;  %s448_s25 = sshll.u32 %s123_s18, 2 }
  0x2f   : > { %s813_s27 = scalar_lea.hbm %s915_s0, %s449_s24  ;;  %s127_s19 = scalar_lea.vmem [#allocation2], %s448_s25 }
  0x30   : > { %s134_s22 = sshll.u32 %s127_s19, 4  ;;  %p815_p11 = pnand %p511_p6, %p35_p8  ;;  %s819_s22 = int_to_ptr.vmem [resolvable:$true] %s134_s22 }
  0x31   : > { %s124_s28 = scalar_lea.sflag [#allocation3], %s123_s18  ;;  %s587_s29 = scalar_lea.hbm %s813_s27, 64 }
  0x32   : > { %p588_p13 = scmp.ne.s32.totalorder %s813_s27, %s587_s29  ;;  %p589_p0 = pneg %p815_p11 }
  0x33   : > { %s592_s4 = scalar_lea.hbm %s915_s0, 128  ;;  %p593_p7 = scmp.lt.u32.totalorder %s813_s27, %s915_s0 }
  0x34   : > { %p590_p3 = pnand %p589_p0, %p588_p13  ;;  %p594_p9 = scmp.lt.u32.totalorder %s592_s4, %s587_s29 }
  0x35   : > { %p596_p1 = scmp.lt.u32.totalorder %s587_s29, %s813_s27 }
  0x36   : > { %p591_p5 = pneg %p590_p3  ;;  %p595_p2 = por %p594_p9, %p593_p7 }
  0x38   : > { %p597_p4 = por %p596_p1, %p595_p2 }
  0x3a   : > { %p598_p6 = pnand %p597_p4, %p591_p5 }
  0x3c   : > { %601 = shalt.err (!%p598_p6)
}
  0x3d   : > { %s602_s7 = scalar_lea.vmem %s819_s22, 64  ;;  %s692_s18 = smov [#allocation2]  }
  0x3e   : > { %p603_p8 = scmp.ne.s32.totalorder %s819_s22, %s602_s7  ;;  %s607_s24 = sshll.u32 %s692_s18, 4  ;;  %s608_s24 = int_to_ptr.vmem [resolvable:$false] %s607_s24 }
  0x3f   : > { %s609_s25 = scalar_lea.vmem %s608_s24, 128  ;;  %p610_p3 = scmp.lt.s32.totalorder %s819_s22, %s608_s24 }
  0x40   : > { %p605_p10 = pnand %p603_p8, %p589_p0  ;;  %p611_p7 = scmp.lt.s32.totalorder %s609_s25, %s602_s7 }
  0x42   : > { %p606_p13 = pneg %p605_p10  ;;  %p612_p9 = por %p611_p7, %p610_p3 }
  0x44   : > { %p613_p2 = pnand %p612_p9, %p606_p13 }
  0x46   : > { %616 = shalt.err (!%p613_p2)
}
  0x47   : > { %505 = dma.hbm_to_vmem [thread:$0]  (!%p815_p11), %s813_s27, 64, %s819_s22, %s124_s28  }
  0x48   : > { %p928_p5 = scmp.ne.s32.totalorder %s923_s17, 0 }
  0x49   : > { %s849_s20 = sand.u32 (!%p928_p5), 1, %s679_s10   ;;  %p929_p0 = scmp.ne.s32.totalorder (!%p928_p5), %s921_s15, 0 }
  0x4a   : > { %143 = sbr.rel (%p928_p5) target bundleno = 1187 (0x4a3), region = 28  ;;  %s451_s26 = sshll.u32 (!%p928_p5), %s849_s20, 2 }
  0x4b   : > { %s146_s19 = scalar_lea.sflag (!%p928_p5), [#allocation3], %s849_s20  ;;  %s149_s29 = scalar_lea.vmem (!%p928_p5), [#allocation2], %s451_s26 }
  0x51   : > { %662 = dma.done.wait (%p929_p0), %s146_s19, 64  }
  0x52   : > { %664 = vsyncadd (%p929_p0), %s146_s19, 4294967232  ;;  %p930_p1 = scmp.eq.s32.totalorder %s734_s13, 0 }
  0x54   : > { %666 = dma.done.wait (%p930_p1), [#allocation6], 256   ;;  %p931_p11 = pmov %p930_p1 }
  0x55   : > { %v693_v0 = vmov 0.0   ;;  %vm694_vm0 = vmmov 0   ;;  %v553_v1 = vld [vmem:[#allocation5] sm:$0xff]   ;;  %v554_v2 = vld [vmem:[#allocation5 + $0x8] sm:$0xff]   ;;  %v175_v3 = vld [vmem:[%s149_s29] sm:$0xf] }
  0x56   : > { %668 = vsyncadd (%p931_p11), [#allocation6], 4294967040  ;;  %470 = vmatprep.subr.bf16.mxu0 %v693_v0  ;;  %474 = vmatprep.mubr.msk.bf16.mxu0 %vm694_vm0, %v693_v0  ;;  %vm192_vm1 = vcmask 261120   ;;  %s695_s15 = smov 112   ;;  %vm240_vm2 = vcmask 130048   ;;  %vm287_vm3 = vcmask 64512  }
  0x57   : > { %478 = vmatprep.subr.bf16.mxu1 %v693_v0  ;;  %480 = vmatprep.mubr.msk.bf16.mxu1 %vm694_vm0, %v693_v0  ;;  %s696_s17 = smov 96   ;;  %vm305_vm4 = vcmask 1043456   ;;  %s453_s27 = sshll.u32 %s849_s20, 3 }
  0x58   : > { %471 = vmatpush3.bf16.msra.mxu0 %v553_v1  ;;  %s460_s22 = sshll.u32 %s734_s13, 7  ;;  %s173_s23 = scalar_lea.vmem [#allocation7], %s453_s27 }
  0x59   : > { %472 = vmatprep.subr.bf16.mxu0 %v693_v0  ;;  %s364_s28 = sshll.u32 %s173_s23, 4  ;;  %s870_s4 = scalar_lea.hbm %s917_s2, %s460_s22  ;;  %s872_s28 = int_to_ptr.vmem [resolvable:$true] %s364_s28 }
  0x5a   : > { %s351_s5 = scalar_lea.sflag [#allocation4], %s849_s20  ;;  %s617_s6 = scalar_lea.vmem %s872_s28, 128 }
  0x5b   : > { %p618_p4 = scmp.ne.s32.totalorder %s872_s28, %s617_s6  ;;  %s697_s13 = smov [#allocation7]  }
  0x5c   : > { %473 = vmatpush3.bf16.msra.mxu0 %v554_v2  ;;  %s621_s7 = sshll.u32 %s697_s13, 4  ;;  %s622_s7 = int_to_ptr.vmem [resolvable:$false] %s621_s7 }
  0x5d   : > { %484 = vmatprep.subr.bf16.mxu0 %v693_v0  ;;  %p619_p6 = pnand %p618_p4, %p804_p12  ;;  %s623_s18 = scalar_lea.vmem %s622_s7, 256 }
  0x5e   : > { %p624_p10 = scmp.lt.s32.totalorder %s872_s28, %s622_s7  ;;  %p625_p13 = scmp.lt.s32.totalorder %s623_s18, %s617_s6 }
  0x5f   : > { %475 = vmatmul.mubr.msk.bf16.vlgmr.msra.gmra.mrb[0].mxu0 %vm192_vm1, %v175_v3  ;;  %p620_p8 = pneg %p619_p6 }
  0x60   : > { %486 = vmatprep.mubr.msk.bf16.mxu0 %vm694_vm0, %v693_v0  ;;  %p626_p3 = por %p625_p13, %p624_p10 }
  0x62   : > { %p627_p7 = pnand %p626_p3, %p620_p8 }
 0x132   : > { %v230_v4 = vpop.f32.mrb[0].mxu0 }
 0x133   : > { %v236_v5 = vpack.c.bf16 %v230_v4, %v230_v4  ;;  %v476_v6 = vpop.f32.mrb[1].mxu0 }
 0x134   : > { %v233_v7 = vpop.f32.mrb[2].mxu0 }
 0x135   : > { %238 = vrot.lane.b32.xlu0 %v236_v5, %s695_s15  ;;  %v477_v8 = vpop.f32.mrb[3].mxu0 }
 0x1a7   : > { %v239_v9 = vpop.permute.xlu0 %238 }
 0x1a8   : > { %v245_v10 = vsel %vm240_vm2, %v239_v9, 0 }
 0x1a9   : > { %479 = vmatpush3.bf16.xpose.msra.mxu1 %v245_v10 }
 0x1b0   : > { %481 = vmatmul.mubr.msk.bf16.vlgmr.msra.gmra.mrb[0].mxu1 %vm240_vm2, %v236_v5 }
 0x283   : > { %v281_v11 = vpop.f32.mrb[0].mxu1 }
 0x284   : > { %v482_v12 = vpop.f32.mrb[1].mxu1  ;;  %v288_v13 = vsel %vm287_vm3, %v281_v11, -inf }
 0x285   : > { %289 = vmax.xlane.f32.xlu0 %v288_v13  ;;  %v284_v14 = vpop.f32.mrb[2].mxu1 }
 0x286   : > { %v483_v15 = vpop.f32.mrb[3].mxu1 }
 0x312   : > { %v290_v16 = vpop.xlane.xlu0 %289 }
 0x313   : > { %v291_v17 = vsub.f32 %v281_v11, %v290_v16 }
 0x315   : > { %v292_v18 = vmul.f32 1.442695, %v291_v17 }
 0x317   : > { %555 = vpow2.f32 %v292_v18 }
 0x321   : > { %v556_v19 = vpop.eup %555 }
 0x322   : > { %v294_v20 = vsel %vm287_vm3, %v556_v19, 0.0 }
 0x323   : > { %295 = vadd.xlane.f32.xlu1 %v294_v20 }
 0x334   : > { %300 = vrot.lane.b32.xlu1 %v236_v5, %s696_s17 }
 0x3b0   : > { %v296_v21 = vpop.xlane.xlu1 %295 }
 0x3b1   : > { %557 = vrcp.f32 %v296_v21 }
 0x3b4   : > { %v301_v22 = vpop.permute.xlu1 %300 }
 0x3b5   : > { %v307_v23 = vsel %vm305_vm4, %v301_v22, 0 }
 0x3b6   : > { %485 = vmatpush3.bf16.msra.mxu0 %v307_v23 }
 0x3bb   : > { %v558_v24 = vpop.eup %557 }
 0x3bc   : > { %v298_v25 = vmul.f32 %v558_v24, %v556_v19 }
 0x3be   : > { %v299_v26 = vpack.c.bf16 %v298_v25, %v298_v25 }
 0x3c0   : > { %487 = vmatmul.mubr.msk.bf16.vlgmr.msra.gmra.mrb[4].mxu0 %vm287_vm3, %v299_v26 }
 0x493   : > { %v343_v27 = vpop.f32.mrb[4].mxu0 }
 0x494   : > { %349 = vst.msk [vmem:[%s173_s23] sm:$0xff] %vm192_vm1, %v343_v27  ;;  %v488_v28 = vpop.f32.mrb[5].mxu0 }
 0x495   : > { %v346_v29 = vpop.f32.mrb[6].mxu0 }
 0x496   : > { %630 = shalt.err (!%p627_p7)
}
 0x497   : > { %s631_s24 = scalar_lea.hbm %s870_s4, 128  ;;  %s635_s26 = scalar_lea.hbm %s917_s2, 256 }
 0x498   : > { %p632_p9 = scmp.ne.s32.totalorder %s870_s4, %s631_s24  ;;  %p636_p0 = scmp.lt.u32.totalorder %s870_s4, %s917_s2 }
 0x499   : > { %p637_p1 = scmp.lt.u32.totalorder %s635_s26, %s631_s24  ;;  %p639_p4 = scmp.lt.u32.totalorder %s631_s24, %s870_s4 }
 0x49a   : > { %p633_p2 = pnand %p632_p9, %p804_p12 }
 0x49b   : > { %p638_p11 = por %p637_p1, %p636_p0 }
 0x49c   : > { %p634_p5 = pneg %p633_p2 }
 0x49d   : > { %p640_p6 = por %p639_p4, %p638_p11 }
 0x49f   : > { %p641_p8 = pnand %p640_p6, %p634_p5 }
 0x4a1   : > { %644 = shalt.err (!%p641_p8)
}
 0x4a2   : > { %496 = dma.vmem_to_hbm [thread:$0]  (%p804_p12), %s872_s28, 128, %s870_s4, %s351_s5   ;;  %v489_v30 = vpop.f32.mrb[7].mxu0 }
 0x4a3 PF: > { %s376_s15 = sand.u32 1, %s675_s9   ;;  %p932_p10 = scmp.ne.s32.totalorder %s922_s16, 0 }
 0x4a4   : > { %p933_p13 = scmp.ge.s32.totalorder %s687_s12, 2  ;;  %s377_s17 = scalar_lea.sflag [#allocation4], %s376_s15 }
 0x4a6   : > { %p507_p3 = pnand %p933_p13, %p932_p10 }
 0x4a8   : > { %670 = dma.done.wait (!%p507_p3), %s377_s17, 128  }
 0x4a9   : > { %672 = vsyncadd (!%p507_p3), %s377_s17, 4294967168  ;;  %p16_p7 = scmp.ge.s32.totalorder %s769_s21, 4   ;;  %s934_s9 = smov %s679_s10 }
 0x4aa   : > { %s935_s10 = smov %s683_s11  ;;  %s936_s11 = smov %s800_s8 }
 0x4ab   : > { %s937_s12 = smov %s769_s21  ;;  %18 = sbr.rel (!%p16_p7) target bundleno = 6 (0x6), region = 77 }
 0x4b2   :  { %382 = vsyncpa [#allocation3], 1 }
 0x4b3   :  { %384 = vsyncpa [#allocation3 + $0x1], 1 }
 0x4b4   :  { %385 = vsyncpa [#allocation6], 1 }
 0x4b5   :  { %386 = vsyncpa [#allocation4], 1 }
 0x4b6   :  { %388 = vsyncpa [#allocation4 + $0x1], 1 }

</bundles_post_ra>
